<compile_context>
chip_gen: v7x
topology: tpu7x:2x2x1
jax: 0.10.0
libtpu: 0.0.40
codegen_flags: <defaults>
</compile_context>

<pallas_src>
import jax
import jax.numpy as jnp
from jax.experimental import pallas as pl
from jax.experimental.pallas import tpu as pltpu


def ntn_kernel(x1_ref, veff_ref, rb_ref, ut_ref, out_ref):
    x1 = x1_ref[...]              # (TN, D)  streamed tile of x_1 rows (bf16/f32)
    veff = veff_ref[...]          # (K, D)   effective row weight, VMEM-resident
    rb = rb_ref[...]              # (K, 1)   row-constant bias,     VMEM-resident
    ut = ut_ref[...]              # (1, K)   U^T,                   VMEM-resident

    # (K, D) x (TN, D)^T -> (K, TN): lane-dense in TN (vs the lane-sparse (TN, K)).
    s_t = jax.lax.dot_general(
        veff, x1, (((1,), (1,)), ((), ())),
        preferred_element_type=jnp.float32)

    # Bias broadcast along lanes + ReLU, all in f32 (safe on v5e: no bf16 VALU).
    # TODO(synk): create_act(inneract) is not defined in the source; ReLU assumed.
    s_t = jnp.maximum(s_t + rb, 0.0)

    # apply_u: (1, K) x (K, TN) -> (1, TN) lane-dense output slab.
    out_ref[...] = jax.lax.dot_general(
        ut, s_t, (((1,), (0,)), ((), ())),
        preferred_element_type=jnp.float32)


def _pick_tile_n(N):
    # Keep >= 2 grid steps when N allows it (v7x has 2 TensorCores and the grid
    # axis is "parallel"), but use large tiles to amortize the ~0.35 us per-step
    # pipeline overhead; the double-buffered x1 tile stays tiny (tile_n*D*2 B).
    half = -(-N // 2)                 # ceil(N / 2)
    half = -(-half // 128) * 128      # round up to a lane-friendly multiple
    return int(min(1024, max(128, half)))


def ntn_forward(x1, x2, V, W, b, U, *, tile_n=None, stream_dtype=jnp.bfloat16):
    """NTN forward pass: x1 (N, D), x2 (1, D) -> (N, 1)."""
    N, D = x1.shape
    K = V.shape[0]
    if tile_n is None:
        tile_n = _pick_tile_n(N)
    grid_n = pl.cdiv(N, tile_n)

    # --- Grid-invariant weight prep, hoisted out of the kernel (done once) ---
    wx2 = jnp.einsum("kde,e->kd", W, x2[0])                        # (K, D)
    veff = V[:, :D] + wx2                                          # (K, D)
    row_bias = (V[:, D:] @ x2[0] + b.reshape(K)).reshape(K, 1)     # (K, 1) f32
    ut = U.reshape(1, K).astype(jnp.float32)                       # (1, K) f32

    # Only x1 scales with N; stream it (and veff, to keep the MXU in one dtype)
    # in the requested dtype with f32 accumulation inside the kernel.
    x1_s = x1.astype(stream_dtype)
    veff_s = veff.astype(stream_dtype)

    out_row = pl.pallas_call(
        ntn_kernel,
        out_shape=jax.ShapeDtypeStruct((1, N), jnp.float32),
        grid=(grid_n,),
        in_specs=[
            pl.BlockSpec((tile_n, D), lambda i: (i, 0)),   # x1: streamed row tiles
            pl.BlockSpec((K, D), lambda i: (0, 0)),        # veff: VMEM-resident
            pl.BlockSpec((K, 1), lambda i: (0, 0)),        # row_bias
            pl.BlockSpec((1, K), lambda i: (0, 0)),        # U^T
        ],
        out_specs=pl.BlockSpec((1, tile_n), lambda i: (0, i)),  # lane-dense output
        compiler_params=pltpu.CompilerParams(
            dimension_semantics=("parallel",)),
    )(x1_s, veff_s, row_bias, ut)

    return out_row.reshape(N, 1)


def ntn_reference(x1, x2, V, W, b, U):
    """Pure-JAX mirror of the PyTorch per-k loop, for correctness checking."""
    K = V.shape[0]
    cols = []
    for i in range(K):
        concat = jnp.concatenate([x1, jnp.ones_like(x1) * x2], axis=1)
        v_out = concat @ V[i].reshape(-1, 1)
        h = (x1 @ W[i]) @ x2.T
        cols.append(v_out + h + b[i])
    out = jnp.concatenate(cols, axis=1)
    out = jnp.maximum(out, 0.0)
    return out @ U


def glorot(key, shape):
    """Xavier/Glorot normal, matching torch.nn.init.xavier_normal_ fan calc."""
    if len(shape) == 2:
        fan_in, fan_out = shape[1], shape[0]
    else:
        rf = 1
        for d in shape[2:]:
            rf *= d
        fan_in, fan_out = shape[1] * rf, shape[0] * rf
    std = (2.0 / (fan_in + fan_out)) ** 0.5
    return std * jax.random.normal(key, shape, dtype=jnp.float32)


if __name__ == "__main__":
    # Module hyper-params: input_dim=32, feature_map_dim=16.
    D, K = 32, 16

    key = jax.random.PRNGKey(0)
    k_x1, k_x2, k_v, k_w, k_b, k_u = jax.random.split(key, 6)

    V = glorot(k_v, (K, 2 * D))                              # (K, 2D)
    W = glorot(k_w, (K, D, D))                               # (K, D, D)
    b = jax.random.normal(k_b, (K,), dtype=jnp.float32)      # bias=True
    U = glorot(k_u, (K, 1))                                  # apply_u=True
    x2 = jax.random.normal(k_x2, (1, D), dtype=jnp.float32)  # (1, D)

    # N=256: exercises 2 grid steps (v7x 2-core split).
    # N=200: exercises the unpadded ragged last block (masked partial stores).
    for N in (256, 200):
        kx = jax.random.fold_in(k_x1, N)
        x1 = jax.random.normal(kx, (N, D), dtype=jnp.float32)
        ref = ntn_reference(x1, x2, V, W, b, U)

        # Exact-precision path (f32 streaming): tight tolerance.
        out32 = jax.block_until_ready(
            ntn_forward(x1, x2, V, W, b, U, stream_dtype=jnp.float32))
        assert out32.shape == (N, 1)
        assert jnp.allclose(out32, ref, atol=1e-4, rtol=1e-4), (N, out32, ref)

        # Bandwidth-optimized path (bf16 streaming, f32 MXU accumulation).
        out16 = jax.block_until_ready(ntn_forward(x1, x2, V, W, b, U))
        assert out16.shape == (N, 1)
        assert jnp.allclose(out16, ref, atol=1e-1, rtol=1e-1), (N, out16, ref)

    print("KERNEL_OK")
</pallas_src>

<mosaic_0001>
module attributes {stable_mosaic.version = 11 : i64} {
  func.func @ntn_kernel(%arg0: i32, %arg1: memref<128x32xf32, #tpu.memory_space<vmem>>, %arg2: memref<16x32xf32, #tpu.memory_space<vmem>>, %arg3: memref<16x1xf32, #tpu.memory_space<vmem>>, %arg4: memref<1x16xf32, #tpu.memory_space<vmem>>, %arg5: memref<1x128xf32, #tpu.memory_space<vmem>>) attributes {dimension_semantics = [#tpu.dimension_semantics<parallel>], iteration_bounds = array<i64: 2>, scalar_prefetch = 0 : i64, scratch_operands = 0 : i64, tpu.core_type = #tpu.core_type<tc>, window_params = [{transform_indices = @transform_0, window_bounds = array<i64: 128, 32>}, {pipeline_mode = #tpu.pipeline_mode<synchronous>, transform_indices = @transform_1, window_bounds = array<i64: 16, 32>}, {pipeline_mode = #tpu.pipeline_mode<synchronous>, transform_indices = @transform_2, window_bounds = array<i64: 16, 1>}, {pipeline_mode = #tpu.pipeline_mode<synchronous>, transform_indices = @transform_3, window_bounds = array<i64: 1, 16>}, {transform_indices = @transform_4, window_bounds = array<i64: 1, 128>}]} {
    %c0 = arith.constant 0 : index
    %c0_0 = arith.constant 0 : index
    %0 = vector.load %arg1[%c0, %c0_0] : memref<128x32xf32, #tpu.memory_space<vmem>>, vector<128x32xf32>
    %c0_1 = arith.constant 0 : index
    %c0_2 = arith.constant 0 : index
    %1 = vector.load %arg2[%c0_1, %c0_2] : memref<16x32xf32, #tpu.memory_space<vmem>>, vector<16x32xf32>
    %c0_3 = arith.constant 0 : index
    %c0_4 = arith.constant 0 : index
    %2 = vector.load %arg3[%c0_3, %c0_4] : memref<16x1xf32, #tpu.memory_space<vmem>>, vector<16x1xf32>
    %c0_5 = arith.constant 0 : index
    %c0_6 = arith.constant 0 : index
    %3 = vector.load %arg4[%c0_5, %c0_6] : memref<1x16xf32, #tpu.memory_space<vmem>>, vector<1x16xf32>
    %cst = arith.constant dense<0.000000e+00> : vector<16x128xf32>
    %4 = tpu.matmul %1, %0, %cst {dimension_numbers = #tpu.dot_dimension_numbers<[1], [1], [0], [0], [0, 0, 1, 0], [], []>} : vector<16x32xf32>, vector<128x32xf32>, vector<16x128xf32> -> vector<16x128xf32>
    %5 = vector.broadcast %2 : vector<16x1xf32> to vector<16x128xf32>
    %6 = arith.addf %4, %5 : vector<16x128xf32>
    %cst_7 = arith.constant 0.000000e+00 : f32
    %7 = vector.broadcast %cst_7 : f32 to vector<16x128xf32>
    %8 = arith.maximumf %6, %7 : vector<16x128xf32>
    %cst_8 = arith.constant dense<0.000000e+00> : vector<1x128xf32>
    %9 = tpu.matmul %3, %8, %cst_8 {dimension_numbers = #tpu.dot_dimension_numbers<[1], [0], [0], [1], [0, 0, 1, 1], [], []>} : vector<1x16xf32>, vector<16x128xf32>, vector<1x128xf32> -> vector<1x128xf32>
    %c0_9 = arith.constant 0 : index
    %c0_10 = arith.constant 0 : index
    %10 = vector.load %arg5[%c0_9, %c0_10] : memref<1x128xf32, #tpu.memory_space<vmem>>, vector<1x128xf32>
    tpu.vector_store %arg5[%c0_9, %c0_10], %9 {strides = array<i32>} : memref<1x128xf32, #tpu.memory_space<vmem>>, vector<1x128xf32>,
    return
  }
  func.func @transform_0(%arg0: i32) -> (i32, i32) {
    %c0_i32 = arith.constant 0 : i32
    %c0_i32_0 = arith.constant 0 : i32
    return %arg0, %c0_i32 : i32, i32
  }
  func.func @transform_1(%arg0: i32) -> (i32, i32) {
    %c0_i32 = arith.constant 0 : i32
    %c0_i32_0 = arith.constant 0 : i32
    %c0_i32_1 = arith.constant 0 : i32
    return %c0_i32, %c0_i32_0 : i32, i32
  }
  func.func @transform_2(%arg0: i32) -> (i32, i32) {
    %c0_i32 = arith.constant 0 : i32
    %c0_i32_0 = arith.constant 0 : i32
    %c0_i32_1 = arith.constant 0 : i32
    return %c0_i32, %c0_i32_0 : i32, i32
  }
  func.func @transform_3(%arg0: i32) -> (i32, i32) {
    %c0_i32 = arith.constant 0 : i32
    %c0_i32_0 = arith.constant 0 : i32
    %c0_i32_1 = arith.constant 0 : i32
    return %c0_i32, %c0_i32_0 : i32, i32
  }
  func.func @transform_4(%arg0: i32) -> (i32, i32) {
    %c0_i32 = arith.constant 0 : i32
    %c0_i32_0 = arith.constant 0 : i32
    return %c0_i32, %arg0 : i32, i32
  }
}

</mosaic_0001>

<bundles_post_ra>
// kernel: tpu_custom_call.1
= control target key start
LH: loop header
LB: loop body
LE: loop exit
PB: predicated region body
PF: predicated region fallthrough
CT: control target
= control target key end

     0   :  { %9 = vsyncpa [#allocation3], 0  ;;  %s955_s0 = inlined_call_operand.vmem [shape: f32[256,32], index: 0, kind: input, shape index: {}]   ;;  %s956_s1 = inlined_call_operand.vmem [shape: f32[16,32], index: 1, kind: input, shape index: {}]   ;;  %s957_s2 = inlined_call_operand.vmem [shape: f32[16,1], index: 2, kind: input, shape index: {}]   ;;  %s958_s3 = inlined_call_operand.vmem [shape: f32[1,16], index: 3, kind: input, shape index: {}]   ;;  %s959_s4 = inlined_call_operand.hbm [shape: f32[1,256], index: 4, kind: output, shape index: {}]  }
   0x1   :  { %11 = vsyncpa [#allocation3 + $0x1], 0  ;;  %s783_s15 = smov 0   ;;  %s785_s16 = smov 0  }
   0x2   :  { %s787_s17 = smov 0   ;;  %s789_s18 = smov 0  }
   0x3 LB: > { %s502_s19 = sadd.s32 4294967295, %s751_s18   ;;  %s503_s20 = sadd.s32 4294967294, %s751_s18   ;;  %s751_s18 = sphi %s789_s18, %s967_s18   ;;  %s747_s17 = sphi %s787_s17, %s966_s17   ;;  %s743_s16 = sphi %s785_s16, %s965_s16   ;;  %s739_s15 = sphi %s783_s15, %s964_s15  }
   0x4   : > { %s806_s21 = sadd.s32 1, %s751_s18   ;;  %s113_s22 = sadd.s32 1, %s747_s17 }
   0x5   : > { %s110_s23 = ssub.s32 %s751_s18, %s806_s21  ;;  %p123_p0 = scmp.ne.s32.totalorder %s747_s17, %s743_s16 }
   0x6   : > { %p111_p1 = scmp.eq.s32.totalorder %s110_s23, 0  ;;  %p124_p2 = scmp.eq.s32.totalorder %s502_s19, 1 }
   0x7   : > { %p129_p3 = scmp.ne.s32.totalorder %s743_s16, %s739_s15  ;;  %p130_p4 = scmp.eq.s32.totalorder %s503_s20, 1 }
   0x8   : > { %s816_s24 = scalar_select %p111_p1, %s747_s17, %s113_s22  }
   0x9   : > { %p818_p5 = por %p124_p2, %p123_p0  ;;  %p822_p6 = por %p130_p4, %p129_p3 }
   0xa   : > { %p506_p7 = scmp.ge.s32.totalorder %s751_s18, 1  ;;  %p166_p8 = scmp.lt.s32.totalorder %s751_s18, 3 }
   0xc   : > { %p167_p9 = pnand %p506_p7, %p166_p8 }
   0xd   : > { %s828_s27 = sshll.u32 (!%p167_p9), %s502_s19, 4  ;;  %vm228_vm0 = vcmask (!%p167_p9), 261120   ;;  %v213_v0 = vld [vmem:[%s956_s1] sm:$0xff] (!%p167_p9)  ;;  %v753_v2 = vmov (!%p167_p9), 0   ;;  %v216_v3 = vld [vmem:[%s957_s2 + $0x8] sm:$0xff] (!%p167_p9)  ;;  %v754_v30 = vmov (!%p167_p9), 0.0|0.0  }
   0xe   : > { %170 = sbr.rel (%p167_p9) target bundleno = 540 (0x21c), region = 36  ;;  %v215_v1 = vld [vmem:[%s957_s2] sm:$0xff] (!%p167_p9)  ;;  %p192_p10 = scmp.lt.s32.totalorder (!%p167_p9), %s828_s27, 31  ;;  %584 = vmatprep.mubr.msk.f32.mxu0 (!%p167_p9), %vm228_vm0, %v213_v0  ;;  %688 = vset.pattern.permute.xlu0 (!%p167_p9), %v753_v2  ;;  %vm849_vm1 = vmpackc.low (!%p167_p9), %vm228_vm0, %vm228_vm0  ;;  %v214_v29 = vld [vmem:[%s956_s1 + $0x8] sm:$0xff] (!%p167_p9)  ;;  %vm755_vm2 = vmmov (!%p167_p9), 0   ;;  %v756_v31 = vmov (!%p167_p9), 0.0  }
   0xf   : > { %220 = vperm.xlu0 (!%p167_p9), %688, %v215_v1   ;;  %642 = vmatprep.subr.bf16.mxu1 (!%p167_p9), %v754_v30  ;;  %v217_v41 = vld [vmem:[%s958_s3] sm:$0x1] (!%p167_p9)  ;;  %vm360_vm3 = vcmask (!%p167_p9), 130048   ;;  %s189_s22 = sand.u32 (!%p167_p9), 1, %s743_s16   ;;  %s915_s5 = scalar_lea.hbm (!%p167_p9), %s959_s4, %s828_s27 }
  0x10   : > { %591 = vmatprep.mubr.msk.f32.mxu1 (!%p167_p9), %vm755_vm2, %v756_v31  ;;  %s190_s23 = scalar_lea.vmem (!%p167_p9), [#allocation2], %s189_s22  ;;  %s757_s8 = smov (!%p167_p9), [#allocation2]  }
  0x11   : > { %s448_s28 = sshll.u32 (!%p167_p9), %s190_s23, 4  ;;  %s909_s28 = int_to_ptr.vmem [resolvable:$true] %s448_s28 }
  0x12   : > { %s689_s7 = scalar_lea.vmem (!%p167_p9), %s909_s28, 16 }
  0x13   : > { %225 = vperm.xlu0 (!%p167_p9), %688, %v216_v3   ;;  %p690_p11 = scmp.ne.s32.totalorder (!%p167_p9), %s909_s28, %s689_s7 }
  0x15   : > { %s193_s6 = scalar_select %p192_p10, %s828_s27, 31 }
  0x16   : > { %p691_p12 = pnand %p690_p11, %p818_p5 }
  0x17   : > { %s508_s9 = sshll.u32 %s193_s6, 3  ;;  %s436_s6 = scalar_lea.sflag [#allocation3], %s189_s22 }
  0x18   : > { %s845_s12 = scalar_lea.vmem %s955_s0, %s508_s9  ;;  %p692_p13 = pneg %p691_p12 }
  0x19   : > { %v197_v5 = vld [vmem:[%s845_s12] sm:$0xff]  ;;  %v198_v6 = vld [vmem:[%s845_s12 + $0x8] sm:$0xff]  ;;  %v199_v7 = vld [vmem:[%s845_s12 + $0x10] sm:$0xff]  ;;  %s693_s9 = sshll.u32 %s757_s8, 4  ;;  %s694_s9 = int_to_ptr.vmem [resolvable:$false] %s693_s9 }
  0x1a   : > { %v594_v8 = vpack.c.bf16 %v198_v6, %v197_v5  ;;  %v200_v9 = vld [vmem:[%s845_s12 + $0x18] sm:$0xff]  ;;  %v201_v11 = vld [vmem:[%s845_s12 + $0x20] sm:$0xff]  ;;  %v202_v12 = vld [vmem:[%s845_s12 + $0x28] sm:$0xff]  ;;  %s695_s10 = scalar_lea.vmem %s694_s9, 32  ;;  %p696_p0 = scmp.lt.s32.totalorder %s909_s28, %s694_s9 }
  0x1b   : > { %v600_v10 = vpack.c.bf16 %v200_v9, %v199_v7  ;;  %v606_v13 = vpack.c.bf16 %v202_v12, %v201_v11  ;;  %v203_v14 = vld [vmem:[%s845_s12 + $0x30] sm:$0xff]  ;;  %v204_v15 = vld [vmem:[%s845_s12 + $0x38] sm:$0xff]  ;;  %v205_v17 = vld [vmem:[%s845_s12 + $0x40] sm:$0xff]  ;;  %p697_p1 = scmp.lt.s32.totalorder %s695_s10, %s689_s7 }
  0x1c   : > { %596 = vmatprep.subr.msk.bf16.mxu0 %vm849_vm1, %v594_v8  ;;  %v612_v16 = vpack.c.bf16 %v204_v15, %v203_v14  ;;  %v206_v18 = vld [vmem:[%s845_s12 + $0x48] sm:$0xff]  ;;  %v207_v20 = vld [vmem:[%s845_s12 + $0x50] sm:$0xff]  ;;  %v208_v21 = vld [vmem:[%s845_s12 + $0x58] sm:$0xff] }
  0x1d   : > { %599 = vmatpush3.bf16.xpose.msk.msra.mxu0 %vm849_vm1, %v594_v8  ;;  %v618_v19 = vpack.c.bf16 %v206_v18, %v205_v17  ;;  %v624_v22 = vpack.c.bf16 %v208_v21, %v207_v20  ;;  %v209_v23 = vld [vmem:[%s845_s12 + $0x60] sm:$0xff]  ;;  %v210_v24 = vld [vmem:[%s845_s12 + $0x68] sm:$0xff]  ;;  %v211_v26 = vld [vmem:[%s845_s12 + $0x70] sm:$0xff]  ;;  %p698_p2 = por %p697_p1, %p696_p0 }
  0x1e   : > { %602 = vmatprep.subr.msk.bf16.mxu0 %vm849_vm1, %v600_v10  ;;  %v630_v25 = vpack.c.bf16 %v210_v24, %v209_v23  ;;  %v212_v27 = vld [vmem:[%s845_s12 + $0x78] sm:$0xff] }
  0x1f   : > { %v636_v28 = vpack.c.bf16 %v212_v27, %v211_v26  ;;  %p699_p3 = pnand %p698_p2, %p692_p13 }
  0x25   : > { %605 = vmatpush3.bf16.xpose.msk.msra.mxu0 %vm849_vm1, %v600_v10 }
  0x26   : > { %608 = vmatprep.subr.msk.bf16.mxu0 %vm849_vm1, %v606_v13 }
  0x2d   : > { %611 = vmatpush3.bf16.xpose.msk.msra.mxu0 %vm849_vm1, %v606_v13 }
  0x2e   : > { %614 = vmatprep.subr.msk.bf16.mxu0 %vm849_vm1, %v612_v16 }
  0x35   : > { %617 = vmatpush3.bf16.xpose.msk.msra.mxu0 %vm849_vm1, %v612_v16 }
  0x36   : > { %620 = vmatprep.subr.msk.bf16.mxu0 %vm849_vm1, %v618_v19 }
  0x3d   : > { %623 = vmatpush3.bf16.xpose.msk.msra.mxu0 %vm849_vm1, %v618_v19 }
  0x3e   : > { %626 = vmatprep.subr.msk.bf16.mxu0 %vm849_vm1, %v624_v22 }
  0x45   : > { %629 = vmatpush3.bf16.xpose.msk.msra.mxu0 %vm849_vm1, %v624_v22 }
  0x46   : > { %632 = vmatprep.subr.msk.bf16.mxu0 %vm849_vm1, %v630_v25 }
  0x4d   : > { %635 = vmatpush3.bf16.xpose.msk.msra.mxu0 %vm849_vm1, %v630_v25 }
  0x4e   : > { %638 = vmatprep.subr.msk.bf16.mxu0 %vm849_vm1, %v636_v28 }
  0x55   : > { %641 = vmatpush3.bf16.xpose.msk.msra.mxu0 %vm849_vm1, %v636_v28 }
  0x5c   : > { %585 = vmatmul.mubr.msk.f32.vlgmr.msra.gmra.mrb[0].mxu0 %vm228_vm0, %v214_v29 }
  0x8e   : > { %v221_v32 = vpop.permute.xlu0 %220 }
  0x92   : > { %v226_v33 = vpop.permute.xlu0 %225 }
 0x12f   : > { %v586_v34 = vpop.f32.mrb[0].mxu0 }
 0x130   : > { %v355_v35 = vadd.f32 %v586_v34, %v226_v33  ;;  %v349_v36 = vpop.f32.mrb[1].mxu0 }
 0x131   : > { %v350_v37 = vadd.f32 %v349_v36, %v221_v32 }
 0x132   : > { %v359_v38 = vmax.f32 %v355_v35, 0.0 }
 0x133   : > { %v358_v39 = vmax.f32 %v350_v37, 0.0 }
 0x135   : > { %v643_v40 = vpack.c.bf16 %v359_v38, %v358_v39 }
 0x137   : > { %644 = vmatpush3.bf16.msra.mxu1 %v643_v40 }
 0x13a   : > { %592 = vmatmul.mubr.msk.f32.vlgmr.msra.gmra.mrb[0].mxu1 %vm360_vm3, %v217_v41 }
 0x20d   : > { %v430_v42 = vpop.f32.mrb[0].mxu1 }
 0x20e   : > { %434 = vst [vmem:[%s190_s23] sm:$0x1] %v430_v42  ;;  %v593_v43 = vpop.f32.mrb[1].mxu1 }
 0x20f   : > { %702 = shalt.err (!%p699_p3)
}
 0x210   : > { %s703_s27 = scalar_lea.hbm %s915_s5, 16  ;;  %s707_s13 = scalar_lea.hbm %s959_s4, 32 }
 0x211   : > { %p704_p4 = scmp.ne.s32.totalorder %s915_s5, %s703_s27  ;;  %p708_p9 = scmp.lt.u32.totalorder %s915_s5, %s959_s4 }
 0x212   : > { %p709_p10 = scmp.lt.u32.totalorder %s707_s13, %s703_s27  ;;  %p711_p12 = scmp.lt.u32.totalorder %s703_s27, %s915_s5 }
 0x213   : > { %p705_p7 = pnand %p704_p4, %p818_p5 }
 0x214   : > { %p710_p11 = por %p709_p10, %p708_p9 }
 0x215   : > { %p706_p8 = pneg %p705_p7 }
 0x216   : > { %p712_p13 = por %p711_p12, %p710_p11 }
 0x218   : > { %p713_p0 = pnand %p712_p13, %p706_p8 }
 0x21a   : > { %716 = shalt.err (!%p713_p0)
}
 0x21b   : > { %645 = dma.vmem_to_hbm [thread:$0]  (%p818_p5), %s909_s28, 16, %s915_s5, %s436_s6  }
 0x21c PF: > { %p651_p1 = scmp.ge.s32.totalorder %s751_s18, 2  ;;  %s460_s20 = sand.u32 1, %s739_s15  }
 0x21d   : > { %s461_s22 = scalar_lea.sflag [#allocation3], %s460_s20 }
 0x21e   : > { %p648_p2 = pnand %p651_p1, %p822_p6 }
 0x220   : > { %734 = dma.done.wait (!%p648_p2), %s461_s22, 16  }
 0x221   : > { %736 = vsyncadd (!%p648_p2), %s461_s22, 4294967280  ;;  %p14_p3 = scmp.ge.s32.totalorder %s806_s21, 4   ;;  %s964_s15 = smov %s743_s16 }
 0x222   : > { %s965_s16 = smov %s747_s17  ;;  %s966_s17 = smov %s816_s24 }
 0x223   : > { %s967_s18 = smov %s806_s21  ;;  %16 = sbr.rel (!%p14_p3) target bundleno = 3 (0x3), region = 71 }
 0x22a   :  { %465 = vsyncpa [#allocation3], 1 }
 0x22b   :  { %467 = vsyncpa [#allocation3 + $0x1], 1 }

</bundles_post_ra>
